<compile_context>
chip_gen: v7x
topology: tpu7x:2x2x1
jax: 0.10.0
libtpu: 0.0.40
codegen_flags: <defaults>
</compile_context>

<pallas_src>
import functools

import jax
import jax.numpy as jnp
from jax import lax
from jax.experimental import pallas as pl
from jax.experimental.pallas import tpu as pltpu


def _grmf_kernel(uidx_ref, iidx_ref,    # VMEM (1, 1, TB) int32 index tiles
                 utab_ref, itab_ref,    # VMEM (D, NU) / (D, NI), resident tables
                 out_ref):              # VMEM (1, 1, TB) f32 score tile
    D, NU = utab_ref.shape
    _, NI = itab_ref.shape
    TB = out_ref.shape[-1]

    uidx = uidx_ref[0]                  # (1, TB) int32, batch on lanes
    iidx = iidx_ref[0]

    # One-hot selectors: table row id on sublanes, batch on lanes.
    # Pure VPU compares; no cross-lane relayout of the indices is needed.
    u_rows = lax.broadcasted_iota(jnp.int32, (NU, TB), 0)
    i_rows = lax.broadcasted_iota(jnp.int32, (NI, TB), 0)
    onehot_u = (u_rows == uidx).astype(utab_ref.dtype)      # (NU, TB)
    onehot_i = (i_rows == iidx).astype(itab_ref.dtype)      # (NI, TB)

    # MXU gather: (D, N) @ (N, TB) -> (D, TB), f32 accumulation.
    u_g = jnp.dot(utab_ref[...], onehot_u, preferred_element_type=jnp.float32)
    i_g = jnp.dot(itab_ref[...], onehot_i, preferred_element_type=jnp.float32)

    # Multiply-reduce over the embedding dim (sublanes) -> lane-resident (1, TB).
    out_ref[0] = jnp.sum(u_g * i_g, axis=0, keepdims=True)


@functools.partial(jax.jit, static_argnames=("tb",))
def _grmf_forward_resident(user_idx, item_idx, user_table, item_table, *, tb):
    B = user_idx.shape[0]
    num_users, D = user_table.shape
    num_items, _ = item_table.shape

    TB = tb                               # lane-dense output tile (128 lanes)
    G = pl.cdiv(B, TB)
    B_pad = G * TB

    # Clamp (no runtime bounds check on TPU) and pad the batch to the tile grid.
    u_idx = jnp.clip(user_idx.astype(jnp.int32), 0, num_users - 1)
    i_idx = jnp.clip(item_idx.astype(jnp.int32), 0, num_items - 1)
    if B_pad != B:
        u_idx = jnp.pad(u_idx, (0, B_pad - B))
        i_idx = jnp.pad(i_idx, (0, B_pad - B))
    u_idx = u_idx.reshape(G, 1, TB)
    i_idx = i_idx.reshape(G, 1, TB)

    # Transpose once in the wrapper (tiny): embedding dim on sublanes so the
    # one-hot matmul lands the batch on lanes.
    utab_t = user_table.T                 # (D, num_users)
    itab_t = item_table.T                 # (D, num_items)

    out = pl.pallas_call(
        _grmf_kernel,
        out_shape=jax.ShapeDtypeStruct((G, 1, TB), jnp.float32),
        grid_spec=pltpu.PrefetchScalarGridSpec(
            num_scalar_prefetch=0,
            grid=(G,),
            in_specs=[
                pl.BlockSpec((1, 1, TB), lambda g: (g, 0, 0)),       # user idx tile
                pl.BlockSpec((1, 1, TB), lambda g: (g, 0, 0)),       # item idx tile
                # Full-array blocks with constant index_map -> tables stay
                # resident in VMEM across all batch tiles.
                pl.BlockSpec((D, num_users), lambda g: (0, 0)),
                pl.BlockSpec((D, num_items), lambda g: (0, 0)),
            ],
            out_specs=pl.BlockSpec((1, 1, TB), lambda g: (g, 0, 0)),
        ),
        compiler_params=pltpu.CompilerParams(
            dimension_semantics=("parallel",),   # batch tiles across TCs (v7x)
        ),
    )(u_idx, i_idx, utab_t, itab_t)

    return out.reshape(-1)[:B]            # (B,) to match torch.sum(u * i, dim=1)


def _vmem_capacity_bytes():
    try:
        return pltpu.get_tpu_info().vmem_capacity_bytes
    except Exception:
        return 64 << 20                   # v7x: smallest per-TC VMEM of current gens


def grmf_forward(user_idx, item_idx, user_table, item_table, *, tb=128):
    """score[b] = sum_d user_table[user_idx[b], d] * item_table[item_idx[b], d]."""
    table_bytes = (user_table.size * user_table.dtype.itemsize
                   + item_table.size * item_table.dtype.itemsize)
    if table_bytes > _vmem_capacity_bytes() // 2:
        # TODO(synk): add an HBM-resident, double-buffered gather path for tables
        # that do not fit in VMEM (not needed at this module's sizes).
        raise NotImplementedError(
            "embedding tables too large for the VMEM-resident fast path")
    return _grmf_forward_resident(user_idx, item_idx, user_table, item_table, tb=tb)


def xavier_uniform(key, shape, dtype=jnp.float32):
    # torch.nn.init.xavier_uniform_ on a 2-D weight (num_embeddings, dim).
    fan_out, fan_in = shape
    bound = (6.0 / (fan_in + fan_out)) ** 0.5
    return jax.random.uniform(key, shape, dtype, minval=-bound, maxval=bound)


if __name__ == "__main__":
    num_nodes, embedding_dim, batch = 257, 16, 200
    num_users = num_items = num_nodes     # GRMF(num_users=num_nodes, num_items=num_nodes)

    key = jax.random.PRNGKey(0)
    k_u, k_i, k_uid, k_iid = jax.random.split(key, 4)

    # Deterministic parameter init (mirrors module __init__ shapes / xavier init).
    user_table = xavier_uniform(k_u, (num_users, embedding_dim))
    item_table = xavier_uniform(k_i, (num_items, embedding_dim))

    # Example inputs: integer user / item ids.
    user = jax.random.randint(k_uid, (batch,), 0, num_users, dtype=jnp.int32)
    item = jax.random.randint(k_iid, (batch,), 0, num_items, dtype=jnp.int32)

    score = grmf_forward(user, item, user_table, item_table)
    score = jax.block_until_ready(score)

    # Pure-JAX reference check.
    ref = jnp.sum(user_table[user] * item_table[item], axis=1)
    assert score.shape == (batch,)
    assert jnp.allclose(score, ref, rtol=1e-5, atol=1e-5)

    print("KERNEL_OK")
</pallas_src>

<mosaic_0001>
module attributes {stable_mosaic.version = 11 : i64} {
  func.func @_grmf_kernel(%arg0: i32, %arg1: memref<1x1x128xi32, #tpu.memory_space<vmem>>, %arg2: memref<1x1x128xi32, #tpu.memory_space<vmem>>, %arg3: memref<16x257xf32, #tpu.memory_space<vmem>>, %arg4: memref<16x257xf32, #tpu.memory_space<vmem>>, %arg5: memref<1x1x128xf32, #tpu.memory_space<vmem>>) attributes {dimension_semantics = [#tpu.dimension_semantics<parallel>], iteration_bounds = array<i64: 2>, scalar_prefetch = 0 : i64, scratch_operands = 0 : i64, tpu.core_type = #tpu.core_type<tc>, window_params = [{transform_indices = @transform_0, window_bounds = array<i64: 1, 1, 128>}, {transform_indices = @transform_1, window_bounds = array<i64: 1, 1, 128>}, {pipeline_mode = #tpu.pipeline_mode<synchronous>, transform_indices = @transform_2, window_bounds = array<i64: 16, 257>}, {pipeline_mode = #tpu.pipeline_mode<synchronous>, transform_indices = @transform_3, window_bounds = array<i64: 16, 257>}, {transform_indices = @transform_4, window_bounds = array<i64: 1, 1, 128>}]} {
    %c0 = arith.constant 0 : index
    %c0_0 = arith.constant 0 : index
    %c0_1 = arith.constant 0 : index
    %0 = vector.load %arg1[%c0, %c0_0, %c0_1] : memref<1x1x128xi32, #tpu.memory_space<vmem>>, vector<1x1x128xi32>
    %1 = vector.shape_cast %0 : vector<1x1x128xi32> to vector<1x128xi32>
    %c0_2 = arith.constant 0 : index
    %c0_3 = arith.constant 0 : index
    %c0_4 = arith.constant 0 : index
    %2 = vector.load %arg2[%c0_2, %c0_3, %c0_4] : memref<1x1x128xi32, #tpu.memory_space<vmem>>, vector<1x1x128xi32>
    %3 = vector.shape_cast %2 : vector<1x1x128xi32> to vector<1x128xi32>
    %4 = tpu.iota {dimensions = array<i32: 0>} : vector<257x128xi32>
    %5 = tpu.iota {dimensions = array<i32: 0>} : vector<257x128xi32>
    %6 = vector.broadcast %1 : vector<1x128xi32> to vector<257x128xi32>
    %7 = arith.cmpi eq, %4, %6 : vector<257x128xi32>
    %8 = arith.extui %7 : vector<257x128xi1> to vector<257x128xi32>
    %9 = arith.sitofp %8 : vector<257x128xi32> to vector<257x128xf32>
    %10 = vector.broadcast %3 : vector<1x128xi32> to vector<257x128xi32>
    %11 = arith.cmpi eq, %5, %10 : vector<257x128xi32>
    %12 = arith.extui %11 : vector<257x128xi1> to vector<257x128xi32>
    %13 = arith.sitofp %12 : vector<257x128xi32> to vector<257x128xf32>
    %c0_5 = arith.constant 0 : index
    %c0_6 = arith.constant 0 : index
    %14 = vector.load %arg3[%c0_5, %c0_6] : memref<16x257xf32, #tpu.memory_space<vmem>>, vector<16x257xf32>
    %cst = arith.constant dense<0.000000e+00> : vector<16x128xf32>
    %15 = tpu.matmul %14, %9, %cst {dimension_numbers = #tpu.dot_dimension_numbers<[1], [0], [0], [1], [0, 0, 1, 1], [], []>} : vector<16x257xf32>, vector<257x128xf32>, vector<16x128xf32> -> vector<16x128xf32>
    %c0_7 = arith.constant 0 : index
    %c0_8 = arith.constant 0 : index
    %16 = vector.load %arg4[%c0_7, %c0_8] : memref<16x257xf32, #tpu.memory_space<vmem>>, vector<16x257xf32>
    %cst_9 = arith.constant dense<0.000000e+00> : vector<16x128xf32>
    %17 = tpu.matmul %16, %13, %cst_9 {dimension_numbers = #tpu.dot_dimension_numbers<[1], [0], [0], [1], [0, 0, 1, 1], [], []>} : vector<16x257xf32>, vector<257x128xf32>, vector<16x128xf32> -> vector<16x128xf32>
    %18 = arith.mulf %15, %17 : vector<16x128xf32>
    %cst_10 = arith.constant dense<0.000000e+00> : vector<128xf32>
    %19 = vector.multi_reduction <add>, %18, %cst_10 [0] : vector<16x128xf32> to vector<128xf32>
    %20 = vector.shape_cast %19 : vector<128xf32> to vector<1x128xf32>
    %c0_11 = arith.constant 0 : index
    %c0_12 = arith.constant 0 : index
    %c0_13 = arith.constant 0 : index
    %21 = vector.load %arg5[%c0_11, %c0_12, %c0_13] : memref<1x1x128xf32, #tpu.memory_space<vmem>>, vector<1x1x128xf32>
    %22 = vector.shape_cast %21 : vector<1x1x128xf32> to vector<1x128xf32>
    %23 = vector.shape_cast %20 : vector<1x128xf32> to vector<1x1x128xf32>
    tpu.vector_store %arg5[%c0_11, %c0_12, %c0_13], %23 {strides = array<i32>} : memref<1x1x128xf32, #tpu.memory_space<vmem>>, vector<1x1x128xf32>,
    return
  }
  func.func @transform_0(%arg0: i32) -> (i32, i32, i32) {
    %c0_i32 = arith.constant 0 : i32
    %c0_i32_0 = arith.constant 0 : i32
    %c0_i32_1 = arith.constant 0 : i32
    return %arg0, %c0_i32, %c0_i32_0 : i32, i32, i32
  }
  func.func @transform_1(%arg0: i32) -> (i32, i32, i32) {
    %c0_i32 = arith.constant 0 : i32
    %c0_i32_0 = arith.constant 0 : i32
    %c0_i32_1 = arith.constant 0 : i32
    return %arg0, %c0_i32, %c0_i32_0 : i32, i32, i32
  }
  func.func @transform_2(%arg0: i32) -> (i32, i32) {
    %c0_i32 = arith.constant 0 : i32
    %c0_i32_0 = arith.constant 0 : i32
    %c0_i32_1 = arith.constant 0 : i32
    return %c0_i32, %c0_i32_0 : i32, i32
  }
  func.func @transform_3(%arg0: i32) -> (i32, i32) {
    %c0_i32 = arith.constant 0 : i32
    %c0_i32_0 = arith.constant 0 : i32
    %c0_i32_1 = arith.constant 0 : i32
    return %c0_i32, %c0_i32_0 : i32, i32
  }
  func.func @transform_4(%arg0: i32) -> (i32, i32, i32) {
    %c0_i32 = arith.constant 0 : i32
    %c0_i32_0 = arith.constant 0 : i32
    %c0_i32_1 = arith.constant 0 : i32
    return %arg0, %c0_i32, %c0_i32_0 : i32, i32, i32
  }
}

</mosaic_0001>

<bundles_post_ra>
// kernel: _grmf_forward_resident.1
= control target key start
LH: loop header
LB: loop body
LE: loop exit
PB: predicated region body
PF: predicated region fallthrough
CT: control target
= control target key end

     0   :  { %9 = vsyncpa [#allocation3], 0  ;;  %s1800_s0 = inlined_call_operand.vmem [shape: s32[2,1,128], index: 0, kind: input, shape index: {}]   ;;  %s1801_s1 = inlined_call_operand.vmem [shape: s32[2,1,128], index: 1, kind: input, shape index: {}]   ;;  %s1802_s2 = inlined_call_operand.hbm [shape: f32[16,257], index: 2, kind: input, shape index: {}]   ;;  %s1803_s3 = inlined_call_operand.hbm [shape: f32[16,257], index: 3, kind: input, shape index: {}]   ;;  %s1804_s4 = inlined_call_operand.hbm [shape: f32[2,1,128], index: 4, kind: output, shape index: {}]  }
   0x1   :  { %10 = vsyncpa [#allocation6], 0 }
   0x2   :  { %11 = vsyncpa [#allocation4], 0 }
   0x3   :  { %13 = vsyncpa [#allocation4 + $0x1], 0  ;;  %s1442_s15 = smov 0   ;;  %s1444_s16 = smov 0  }
   0x4   :  { %s1446_s17 = smov 0   ;;  %s1448_s18 = smov 0  }
   0x5 LB: > { %s1463_s19 = sadd.s32 4294967295, %s1408_s18   ;;  %s913_s20 = sadd.s32 4294967294, %s1408_s18   ;;  %s1408_s18 = sphi %s1448_s18, %s1828_s18   ;;  %s1404_s17 = sphi %s1446_s17, %s1827_s17   ;;  %s1400_s16 = sphi %s1444_s16, %s1826_s16   ;;  %s1396_s15 = sphi %s1442_s15, %s1825_s15  }
   0x6   : > { %s1467_s21 = sadd.s32 1, %s1408_s18   ;;  %s120_s22 = sadd.s32 1, %s1404_s17 }
   0x7   : > { %s117_s23 = ssub.s32 %s1408_s18, %s1467_s21  ;;  %p130_p0 = scmp.ne.s32.totalorder %s1404_s17, %s1400_s16 }
   0x8   : > { %p118_p1 = scmp.eq.s32.totalorder %s117_s23, 0  ;;  %p131_p2 = scmp.eq.s32.totalorder %s1463_s19, 1 }
   0x9   : > { %p136_p3 = scmp.ne.s32.totalorder %s1400_s16, %s1396_s15  ;;  %p137_p4 = scmp.eq.s32.totalorder %s913_s20, 1 }
   0xa   : > { %s1478_s24 = scalar_select %p118_p1, %s1404_s17, %s120_s22  }
   0xb   : > { %p1480_p5 = por %p131_p2, %p130_p0  ;;  %p1484_p6 = por %p137_p4, %p136_p3 }
   0xc   : > { %p914_p7 = scmp.ge.s32.totalorder %s1408_s18, 1  ;;  %p144_p8 = scmp.lt.s32.totalorder %s1408_s18, 3 }
   0xd   : > { %s1810_s25 = scalar_select %p1480_p5, 1, 0 }
   0xe   : > { %s1811_s26 = scalar_select %p1484_p6, 1, 0 }
   0xf   : > { %p1805_p9 = scmp.eq.s32.totalorder %s1463_s19, 0  ;;  %p1491_p10 = pnand %p914_p7, %p144_p8 }
  0x10   : > { %s1410_s28 = smov [#allocation2]   ;;  %s1411_s5 = smov [#allocation5]  }
  0x11   : > { %s1812_s27 = scalar_select %p1491_p10, 1, 0 }
  0x12   : > { %s156_s29 = sshll.u32 %s1410_s28, 4  ;;  %p1228_p11 = pneg %p1491_p10  ;;  %s157_s29 = int_to_ptr.vmem [resolvable:$true] %s156_s29 }
  0x13   : > { %s169_s6 = sshll.u32 %s1411_s5, 4  ;;  %s1282_s9 = scalar_lea.hbm %s1802_s2, 768  ;;  %s1503_s6 = int_to_ptr.vmem [resolvable:$true] %s169_s6 }
  0x14   : > { %p1499_p12 = pnand %p1805_p9, %p1228_p11  ;;  %p1283_p13 = scmp.ne.s32.totalorder %s1802_s2, %s1282_s9 }
  0x15   : > { %p1289_p3 = scmp.lt.u32.totalorder %s1282_s9, %s1802_s2 }
  0x16   : > { %p1284_p0 = pneg %p1499_p12 }
  0x18   : > { %p1285_p1 = pnand %p1284_p0, %p1283_p13 }
  0x1a   : > { %p1286_p2 = pneg %p1285_p1 }
  0x1c   : > { %p1291_p4 = pnand %p1289_p3, %p1286_p2 }
  0x1e   : > { %1294 = shalt.err (!%p1291_p4)
}
  0x1f   : > { %s1295_s14 = scalar_lea.vmem %s157_s29, 768  ;;  %p1303_p9 = scmp.lt.s32.totalorder %s157_s29, %s157_s29 }
  0x20   : > { %p1296_p7 = scmp.ne.s32.totalorder %s157_s29, %s1295_s14  ;;  %p1304_p6 = scmp.lt.s32.totalorder %s1295_s14, %s1295_s14 }
  0x22   : > { %p1298_p8 = pnand %p1296_p7, %p1284_p0  ;;  %p1305_p5 = por %p1304_p6, %p1303_p9 }
  0x24   : > { %p1299_p11 = pneg %p1298_p8 }
  0x26   : > { %p1306_p10 = pnand %p1305_p5, %p1299_p11 }
  0x28   : > { %1309 = shalt.err (!%p1306_p10)
}
  0x29   : > { %s1412_s20 = smov 384   ;;  %s1413_s22 = smov 24  }
  0x2a   : > { %1231 = dma.hbm_to_vmem [thread:$0]  (!%p1499_p12), %s1802_s2, 768, %s157_s29, [#allocation3], %s1412_s20, %s1412_s20, %s1413_s22  }
  0x2b   : > { %s1310_s8 = scalar_lea.hbm %s1803_s3, 768 }
  0x2c   : > { %p1311_p13 = scmp.ne.s32.totalorder %s1803_s3, %s1310_s8  ;;  %p1317_p9 = scmp.lt.u32.totalorder %s1310_s8, %s1803_s3 }
  0x2e   : > { %p1313_p5 = pnand %p1311_p13, %p1284_p0 }
  0x30   : > { %p1314_p6 = pneg %p1313_p5 }
  0x32   : > { %p1319_p10 = pnand %p1317_p9, %p1314_p6 }
  0x34   : > { %1322 = shalt.err (!%p1319_p10)
}
  0x35   : > { %s1323_s29 = scalar_lea.vmem %s1503_s6, 768  ;;  %p1331_p4 = scmp.lt.s32.totalorder %s1503_s6, %s1503_s6 }
  0x36   : > { %p1324_p1 = scmp.ne.s32.totalorder %s1503_s6, %s1323_s29  ;;  %p1332_p7 = scmp.lt.s32.totalorder %s1323_s29, %s1323_s29 }
  0x38   : > { %p1326_p2 = pnand %p1324_p1, %p1284_p0  ;;  %p1333_p8 = por %p1332_p7, %p1331_p4 }
  0x3a   : > { %p1327_p3 = pneg %p1326_p2 }
  0x3c   : > { %p1334_p11 = pnand %p1333_p8, %p1327_p3 }
  0x3e   : > { %1337 = shalt.err (!%p1334_p11)
}
  0x3f   : > { %1234 = dma.hbm_to_vmem [thread:$0]  (!%p1499_p12), %s1803_s3, 768, %s1503_s6, [#allocation6], %s1412_s20, %s1412_s20, %s1413_s22  }
  0x40   : > { %p1814_p13 = scmp.ne.s32.totalorder %s1812_s27, 0 }
  0x41   : > { %p1815_p5 = scmp.eq.s32.totalorder (!%p1814_p13), %s1463_s19, 0 }
  0x42   : > { %197 = sbr.rel (%p1814_p13) target bundleno = 371 (0x173), region = 36 }
  0x49   : > { %1383 = dma.done.wait (%p1815_p5), [#allocation3], 768   ;;  %p1816_p0 = pmov %p1815_p5 }
  0x4b   : > { %1385 = vsyncadd (%p1816_p0), [#allocation3], 4294966528  ;;  %p1817_p6 = pmov %p1816_p0 }
  0x4c   : > { %p1818_p9 = pmov %p1816_p0 }
  0x4d   : > { %1387 = dma.done.wait (%p1817_p6), [#allocation6], 768  }
  0x4e   : > { %1389 = vsyncadd (%p1818_p9), [#allocation6], 4294966528  ;;  %p227_p10 = scmp.lt.s32.totalorder %s1463_s19, 1  ;;  %v235_v0 = vlaneseq  ;;  %vm1808_vm0 = vcmask 7168   ;;  %vm1809_vm1 = vcmask 1040384   ;;  %v477_v11 = vld [vmem:[#allocation2 + $0x10] sm:$0xff] }
  0x4f   : > { %1146 = vmatprep.mubr.msk.f32.mxu1 %vm1808_vm0, %v477_v11  ;;  %v476_v14 = vld [vmem:[#allocation2 + $0x8] sm:$0xff]  ;;  %v1414_v15 = vmov 0.0   ;;  %v1415_v19 = vmov 1.0|1.0   ;;  %v643_v24 = vld [vmem:[#allocation5 + $0x8] sm:$0xff]  ;;  %v475_v44 = vld [vmem:[#allocation2] sm:$0xff] }
  0x50   : > { %s228_s30 = scalar_select %p227_p10, %s1463_s19, 1  ;;  %v1564_v1 = vshrl.u32 %v235_v0, 7  ;;  %v480_v17 = vld [vmem:[#allocation2 + $0x28] sm:$0xff]  ;;  %556 = vmatprep.mubr.f32.mxu0 %v476_v14  ;;  %v479_v45 = vld [vmem:[#allocation2 + $0x20] sm:$0xff]  ;;  %v642_v46 = vld [vmem:[#allocation5] sm:$0xff] }
  0x51   : > { %v646_v47 = vld [vmem:[#allocation5 + $0x20] sm:$0xff]  ;;  %v478_v48 = vld [vmem:[#allocation2 + $0x18] sm:$0xff]  ;;  %v644_v49 = vld [vmem:[#allocation5 + $0x10] sm:$0xff]  ;;  %s225_s5 = sand.u32 1, %s1400_s16   ;;  %s1059_s7 = sshll.u32 %s1463_s19, 4 }
  0x52   : > { %s229_s20 = scalar_lea.vmem %s1800_s0, %s228_s30  ;;  %v252_v2 = vadd.s32 128, %v1564_v1  ;;  %v253_v3 = vadd.s32 136, %v1564_v1  ;;  %s232_s28 = scalar_lea.vmem %s1801_s1, %s228_s30  ;;  %v1575_v4 = vadd.s32 256, %v1564_v1  ;;  %v237_v5 = vadd.s32 8, %v1564_v1  ;;  %v645_v50 = vld [vmem:[#allocation5 + $0x18] sm:$0xff]  ;;  %v647_v51 = vld [vmem:[#allocation5 + $0x28] sm:$0xff] }
  0x53   : > { %v254_v6 = vadd.s32 144, %v1564_v1  ;;  %v255_v7 = vadd.s32 152, %v1564_v1  ;;  %v238_v8 = vadd.s32 16, %v1564_v1  ;;  %v1581_v9 = vld [vmem:[%s229_s20] ss:$0 sm:$0xff]  ;;  %v239_v12 = vadd.s32 24, %v1564_v1  ;;  %s1758_s12 = scalar_lea.hbm %s1804_s4, %s1059_s7 }
  0x54   : > { %v1583_v10 = vld [vmem:[%s232_s28] ss:$0 sm:$0xff]  ;;  %vm289_vm2 = vcmp.eq.s32.totalorder %v252_v2, %v1581_v9  ;;  %vm290_vm3 = vcmp.eq.s32.totalorder %v253_v3, %v1581_v9  ;;  %vm305_vm4 = vcmp.eq.s32.totalorder %v1575_v4, %v1581_v9  ;;  %v1592_v13 = vadd.s32 160, %v1564_v1  ;;  %s226_s8 = scalar_lea.vmem [#allocation7], %s225_s5  ;;  %s818_s29 = scalar_lea.sflag [#allocation4], %s225_s5 }
  0x55   : > { %vm1154_vm5 = vmpackc.low %vm290_vm3, %vm289_vm2  ;;  %v954_v16 = vsel %vm305_vm4, 1.0, %v1414_v15  ;;  %vm273_vm6 = vcmp.eq.s32.totalorder %v1564_v1, %v1581_v9  ;;  %vm274_vm7 = vcmp.eq.s32.totalorder %v237_v5, %v1581_v9  ;;  %v257_v18 = vadd.s32 168, %v1564_v1  ;;  %s830_s9 = sshll.u32 %s226_s8, 4  ;;  %p1823_p1 = scmp.ne.s32.totalorder %s1810_s25, 0  ;;  %s1760_s9 = int_to_ptr.vmem [resolvable:$true] %s830_s9 }
  0x56   : > { %1155 = vmatprep.subr.msk.bf16.mxu0 %vm1154_vm5, %v1415_v19  ;;  %1144 = vmatprep.subr.msk.mxu1 %vm1809_vm1, %v954_v16  ;;  %vm1156_vm8 = vmpackc.low %vm274_vm7, %vm273_vm6  ;;  %vm392_vm9 = vcmp.eq.s32.totalorder %v252_v2, %v1583_v10  ;;  %vm393_vm10 = vcmp.eq.s32.totalorder %v253_v3, %v1583_v10  ;;  %vm376_vm11 = vcmp.eq.s32.totalorder %v1564_v1, %v1583_v10  ;;  %v240_v20 = vadd.s32 32, %v1564_v1  ;;  %s1338_s13 = scalar_lea.vmem %s1760_s9, 16  ;;  %s1416_s19 = smov [#allocation7]  }
  0x57   : > { %1157 = vmatpush3.bf16.msk.msra.mxu0 %vm1156_vm8, %v1415_v19  ;;  %1145 = vmatpush3.msk.msra.mxu1 %vm1809_vm1, %v954_v16  ;;  %vm1186_vm12 = vmpackc.low %vm393_vm10, %vm392_vm9  ;;  %vm377_vm13 = vcmp.eq.s32.totalorder %v237_v5, %v1583_v10  ;;  %vm291_vm14 = vcmp.eq.s32.totalorder %v254_v6, %v1581_v9  ;;  %vm292_vm15 = vcmp.eq.s32.totalorder %v255_v7, %v1581_v9  ;;  %v241_v21 = vadd.s32 40, %v1564_v1  ;;  %p1339_p12 = scmp.ne.s32.totalorder %s1760_s9, %s1338_s13  ;;  %s1342_s14 = sshll.u32 %s1416_s19, 4  ;;  %s1343_s14 = int_to_ptr.vmem [resolvable:$false] %s1342_s14 }
  0x58   : > { %1187 = vmatprep.subr.msk.bf16.mxu1 %vm1186_vm12, %v1415_v19  ;;  %1147 = vmatmul.mubr.msk.f32.vlgmr.msra.gmra.mrb[0].mxu1 %vm1808_vm0, %v480_v17  ;;  %vm1188_vm2 = vmpackc.low %vm377_vm13, %vm376_vm11  ;;  %vm275_vm3 = vcmp.eq.s32.totalorder %v238_v8, %v1581_v9  ;;  %vm276_vm4 = vcmp.eq.s32.totalorder %v239_v12, %v1581_v9  ;;  %vm394_vm5 = vcmp.eq.s32.totalorder %v254_v6, %v1583_v10  ;;  %v258_v22 = vadd.s32 176, %v1564_v1  ;;  %s1344_s30 = scalar_lea.vmem %s1343_s14, 32  ;;  %p1345_p4 = scmp.lt.s32.totalorder %s1760_s9, %s1343_s14 }
  0x59   : > { %1189 = vmatpush3.bf16.msk.msra.mxu1 %vm1188_vm2, %v1415_v19  ;;  %vm1158_vm6 = vmpackc.low %vm292_vm15, %vm291_vm14  ;;  %vm395_vm7 = vcmp.eq.s32.totalorder %v255_v7, %v1583_v10  ;;  %vm378_vm8 = vcmp.eq.s32.totalorder %v238_v8, %v1583_v10  ;;  %vm379_vm9 = vcmp.eq.s32.totalorder %v239_v12, %v1583_v10  ;;  %vm293_vm11 = vcmp.eq.s32.totalorder %v1592_v13, %v1581_v9  ;;  %p1340_p2 = pnand %p1339_p12, %p1823_p1  ;;  %p1346_p7 = scmp.lt.s32.totalorder %s1344_s30, %s1338_s13 }
  0x5a   : > { %1159 = vmatprep.subr.msk.bf16.mxu0 %vm1158_vm6, %v1415_v19  ;;  %vm1160_vm10 = vmpackc.low %vm276_vm4, %vm275_vm3  ;;  %vm294_vm12 = vcmp.eq.s32.totalorder %v257_v18, %v1581_v9  ;;  %v259_v23 = vadd.s32 184, %v1564_v1  ;;  %vm277_vm14 = vcmp.eq.s32.totalorder %v240_v20, %v1581_v9  ;;  %vm278_vm15 = vcmp.eq.s32.totalorder %v241_v21, %v1581_v9  ;;  %721 = vmatprep.mubr.f32.mxu1 %v643_v24 }
  0x5b   : > { %1161 = vmatpush3.bf16.msk.msra.mxu0 %vm1160_vm10, %v1415_v19  ;;  %vm1190_vm13 = vmpackc.low %vm395_vm7, %vm394_vm5  ;;  %v242_v25 = vadd.s32 48, %v1564_v1  ;;  %v243_v26 = vadd.s32 56, %v1564_v1  ;;  %vm396_vm3 = vcmp.eq.s32.totalorder %v1592_v13, %v1583_v10  ;;  %vm397_vm4 = vcmp.eq.s32.totalorder %v257_v18, %v1583_v10  ;;  %p1341_p3 = pneg %p1340_p2  ;;  %p1347_p8 = por %p1346_p7, %p1345_p4 }
  0x5c   : > { %1191 = vmatprep.subr.msk.bf16.mxu1 %vm1190_vm13, %v1415_v19  ;;  %vm1192_vm2 = vmpackc.low %vm379_vm9, %vm378_vm8  ;;  %vm380_vm6 = vcmp.eq.s32.totalorder %v240_v20, %v1583_v10  ;;  %vm381_vm7 = vcmp.eq.s32.totalorder %v241_v21, %v1583_v10  ;;  %vm295_vm9 = vcmp.eq.s32.totalorder %v258_v22, %v1581_v9  ;;  %vm296_vm10 = vcmp.eq.s32.totalorder %v259_v23, %v1581_v9 }
  0x5d   : > { %1193 = vmatpush3.bf16.msk.msra.mxu1 %vm1192_vm2, %v1415_v19  ;;  %vm1162_vm5 = vmpackc.low %vm294_vm12, %vm293_vm11  ;;  %v260_v27 = vadd.s32 192, %v1564_v1  ;;  %v261_v28 = vadd.s32 200, %v1564_v1  ;;  %vm279_vm11 = vcmp.eq.s32.totalorder %v242_v25, %v1581_v9  ;;  %vm280_vm12 = vcmp.eq.s32.totalorder %v243_v26, %v1581_v9  ;;  %p1348_p11 = pnand %p1347_p8, %p1341_p3 }
  0x5e   : > { %1163 = vmatprep.subr.msk.bf16.mxu0 %vm1162_vm5, %v1415_v19  ;;  %vm1164_vm8 = vmpackc.low %vm278_vm15, %vm277_vm14  ;;  %v244_v29 = vadd.s32 64, %v1564_v1  ;;  %v245_v30 = vadd.s32 72, %v1564_v1  ;;  %vm398_vm15 = vcmp.eq.s32.totalorder %v258_v22, %v1583_v10  ;;  %vm399_vm2 = vcmp.eq.s32.totalorder %v259_v23, %v1583_v10 }
  0x5f   : > { %1165 = vmatpush3.bf16.msk.msra.mxu0 %vm1164_vm8, %v1415_v19  ;;  %vm1194_vm13 = vmpackc.low %vm397_vm4, %vm396_vm3  ;;  %vm382_vm4 = vcmp.eq.s32.totalorder %v242_v25, %v1583_v10  ;;  %vm383_vm5 = vcmp.eq.s32.totalorder %v243_v26, %v1583_v10  ;;  %v262_v31 = vadd.s32 208, %v1564_v1  ;;  %v263_v32 = vadd.s32 216, %v1564_v1 }
  0x60   : > { %1195 = vmatprep.subr.msk.bf16.mxu1 %vm1194_vm13, %v1415_v19  ;;  %vm1196_vm14 = vmpackc.low %vm381_vm7, %vm380_vm6  ;;  %vm297_vm13 = vcmp.eq.s32.totalorder %v260_v27, %v1581_v9  ;;  %vm298_vm6 = vcmp.eq.s32.totalorder %v261_v28, %v1581_v9  ;;  %v246_v33 = vadd.s32 80, %v1564_v1  ;;  %v247_v34 = vadd.s32 88, %v1564_v1 }
  0x61   : > { %1197 = vmatpush3.bf16.msk.msra.mxu1 %vm1196_vm14, %v1415_v19  ;;  %vm1166_vm3 = vmpackc.low %vm296_vm10, %vm295_vm9  ;;  %vm281_vm9 = vcmp.eq.s32.totalorder %v244_v29, %v1581_v9  ;;  %vm282_vm10 = vcmp.eq.s32.totalorder %v245_v30, %v1581_v9  ;;  %vm401_vm14 = vcmp.eq.s32.totalorder %v261_v28, %v1583_v10  ;;  %v264_v35 = vadd.s32 224, %v1564_v1 }
  0x62   : > { %1167 = vmatprep.subr.msk.bf16.mxu0 %vm1166_vm3, %v1415_v19  ;;  %vm1168_vm8 = vmpackc.low %vm280_vm12, %vm279_vm11  ;;  %vm400_vm12 = vcmp.eq.s32.totalorder %v260_v27, %v1583_v10  ;;  %vm385_vm3 = vcmp.eq.s32.totalorder %v245_v30, %v1583_v10  ;;  %v265_v36 = vadd.s32 232, %v1564_v1  ;;  %v248_v37 = vadd.s32 96, %v1564_v1 }
  0x63   : > { %1169 = vmatpush3.bf16.msk.msra.mxu0 %vm1168_vm8, %v1415_v19  ;;  %vm1198_vm7 = vmpackc.low %vm399_vm2, %vm398_vm15  ;;  %vm384_vm2 = vcmp.eq.s32.totalorder %v244_v29, %v1583_v10  ;;  %v249_v38 = vadd.s32 104, %v1564_v1  ;;  %v266_v39 = vadd.s32 240, %v1564_v1  ;;  %v267_v40 = vadd.s32 248, %v1564_v1 }
  0x64   : > { %1199 = vmatprep.subr.msk.bf16.mxu1 %vm1198_vm7, %v1415_v19  ;;  %vm1200_vm11 = vmpackc.low %vm383_vm5, %vm382_vm4  ;;  %vm299_vm7 = vcmp.eq.s32.totalorder %v262_v31, %v1581_v9  ;;  %vm300_vm4 = vcmp.eq.s32.totalorder %v263_v32, %v1581_v9  ;;  %v250_v41 = vadd.s32 112, %v1564_v1  ;;  %v251_v42 = vadd.s32 120, %v1564_v1 }
  0x65   : > { %1201 = vmatpush3.bf16.msk.msra.mxu1 %vm1200_vm11, %v1415_v19  ;;  %vm1170_vm15 = vmpackc.low %vm298_vm6, %vm297_vm13  ;;  %vm283_vm13 = vcmp.eq.s32.totalorder %v246_v33, %v1581_v9  ;;  %vm284_vm6 = vcmp.eq.s32.totalorder %v247_v34, %v1581_v9  ;;  %vm403_vm11 = vcmp.eq.s32.totalorder %v263_v32, %v1583_v10  ;;  %vm406_vm1 = vcmp.eq.s32.totalorder %v266_v39, %v1583_v10 }
  0x66   : > { %1171 = vmatprep.subr.msk.bf16.mxu0 %vm1170_vm15, %v1415_v19  ;;  %vm1172_vm8 = vmpackc.low %vm282_vm10, %vm281_vm9  ;;  %vm402_vm10 = vcmp.eq.s32.totalorder %v262_v31, %v1583_v10  ;;  %vm387_vm15 = vcmp.eq.s32.totalorder %v247_v34, %v1583_v10  ;;  %vm287_vm0 = vcmp.eq.s32.totalorder %v250_v41, %v1581_v9 }
  0x67   : > { %1173 = vmatpush3.bf16.msk.msra.mxu0 %vm1172_vm8, %v1415_v19  ;;  %vm1202_vm5 = vmpackc.low %vm401_vm14, %vm400_vm12  ;;  %vm386_vm14 = vcmp.eq.s32.totalorder %v246_v33, %v1583_v10 }
  0x68   : > { %1203 = vmatprep.subr.msk.bf16.mxu1 %vm1202_vm5, %v1415_v19  ;;  %vm1204_vm9 = vmpackc.low %vm385_vm3, %vm384_vm2  ;;  %vm301_vm5 = vcmp.eq.s32.totalorder %v264_v35, %v1581_v9  ;;  %vm302_vm2 = vcmp.eq.s32.totalorder %v265_v36, %v1581_v9 }
  0x69   : > { %1205 = vmatpush3.bf16.msk.msra.mxu1 %vm1204_vm9, %v1415_v19  ;;  %vm1174_vm12 = vmpackc.low %vm300_vm4, %vm299_vm7  ;;  %vm285_vm7 = vcmp.eq.s32.totalorder %v248_v37, %v1581_v9  ;;  %vm286_vm4 = vcmp.eq.s32.totalorder %v249_v38, %v1581_v9  ;;  %vm405_vm9 = vcmp.eq.s32.totalorder %v265_v36, %v1583_v10 }
  0x6a   : > { %1175 = vmatprep.subr.msk.bf16.mxu0 %vm1174_vm12, %v1415_v19  ;;  %vm1176_vm8 = vmpackc.low %vm284_vm6, %vm283_vm13  ;;  %vm404_vm6 = vcmp.eq.s32.totalorder %v264_v35, %v1583_v10  ;;  %vm389_vm12 = vcmp.eq.s32.totalorder %v249_v38, %v1583_v10 }
  0x6b   : > { %1177 = vmatpush3.bf16.msk.msra.mxu0 %vm1176_vm8, %v1415_v19  ;;  %vm1206_vm3 = vmpackc.low %vm403_vm11, %vm402_vm10  ;;  %vm388_vm11 = vcmp.eq.s32.totalorder %v248_v37, %v1583_v10  ;;  %vm408_vm8 = vcmp.eq.s32.totalorder %v1575_v4, %v1583_v10 }
  0x6c   : > { %1207 = vmatprep.subr.msk.bf16.mxu1 %vm1206_vm3, %v1415_v19  ;;  %vm1208_vm13 = vmpackc.low %vm387_vm15, %vm386_vm14  ;;  %vm303_vm14 = vcmp.eq.s32.totalorder %v266_v39, %v1581_v9  ;;  %vm304_vm15 = vcmp.eq.s32.totalorder %v267_v40, %v1581_v9  ;;  %v988_v43 = vsel %vm408_vm8, 1.0, %v1414_v15 }
  0x6d   : > { %1209 = vmatpush3.bf16.msk.msra.mxu1 %vm1208_vm13, %v1415_v19  ;;  %vm1178_vm10 = vmpackc.low %vm302_vm2, %vm301_vm5  ;;  %vm288_vm5 = vcmp.eq.s32.totalorder %v251_v42, %v1581_v9 }
  0x6e   : > { %1179 = vmatprep.subr.msk.bf16.mxu0 %vm1178_vm10, %v1415_v19  ;;  %vm1180_vm3 = vmpackc.low %vm286_vm4, %vm285_vm7  ;;  %vm407_vm10 = vcmp.eq.s32.totalorder %v267_v40, %v1583_v10  ;;  %vm390_vm4 = vcmp.eq.s32.totalorder %v250_v41, %v1583_v10 }
  0x6f   : > { %1181 = vmatpush3.bf16.msk.msra.mxu0 %vm1180_vm3, %v1415_v19  ;;  %vm1210_vm13 = vmpackc.low %vm405_vm9, %vm404_vm6  ;;  %vm391_vm6 = vcmp.eq.s32.totalorder %v251_v42, %v1583_v10 }
  0x70   : > { %1211 = vmatprep.subr.msk.bf16.mxu1 %vm1210_vm13, %v1415_v19  ;;  %vm1212_vm2 = vmpackc.low %vm389_vm12, %vm388_vm11  ;;  %vm1819_vm12 = vcmask 1040384  }
  0x71   : > { %1213 = vmatpush3.bf16.msk.msra.mxu1 %vm1212_vm2, %v1415_v19  ;;  %vm1182_vm7 = vmpackc.low %vm304_vm15, %vm303_vm14 }
  0x72   : > { %1183 = vmatprep.subr.msk.bf16.mxu0 %vm1182_vm7, %v1415_v19  ;;  %vm1184_vm9 = vmpackc.low %vm288_vm5, %vm287_vm0  ;;  %vm1821_vm0 = vcmask 7168  }
  0x73   : > { %1185 = vmatpush3.bf16.msk.msra.mxu0 %vm1184_vm9, %v1415_v19  ;;  %vm1214_vm3 = vmpackc.low %vm407_vm10, %vm406_vm1 }
  0x74   : > { %1215 = vmatprep.subr.msk.bf16.mxu1 %vm1214_vm3, %v1415_v19  ;;  %vm1216_vm11 = vmpackc.low %vm391_vm6, %vm390_vm4  ;;  %1149 = vmatprep.subr.msk.mxu0 %vm1819_vm12, %v988_v43 }
  0x75   : > { %1217 = vmatpush3.bf16.msk.msra.mxu1 %vm1216_vm11, %v1415_v19  ;;  %vm1820_vm8 = vmmov %vm1819_vm12 }
  0x76   : > { %557 = vmatmul.mubr.f32.vlgmr.msra.gmra.mrb[0].mxu0 %v475_v44  ;;  %vm1822_vm1 = vmmov %vm1821_vm0 }
  0x77   : > { %1150 = vmatpush3.msk.msra.mxu0 %vm1820_vm8, %v988_v43  ;;  %561 = vmatprep.mubr.f32.mxu0 %v479_v45 }
  0x78   : > { %722 = vmatmul.mubr.f32.vlgmr.msra.gmra.mrb[2].mxu1 %v642_v46 }
  0x79   : > { %726 = vmatprep.mubr.f32.mxu1 %v646_v47 }
  0x7a   : > { %562 = vmatmul.mubr.f32.gmra.mrb[2].mxu0 %v478_v48 }
  0x7b   : > { %1151 = vmatprep.mubr.msk.f32.mxu0 %vm1821_vm0, %v644_v49 }
  0x7c   : > { %727 = vmatmul.mubr.f32.gmra.mrb[4].mxu1 %v645_v50 }
  0x7e   : > { %1152 = vmatmul.mubr.msk.f32.vlgmr.msra.gmra.mrb[4].mxu0 %vm1822_vm1, %v647_v51 }
 0x12b   : > { %v1148_v52 = vpop.f32.mrb[0].mxu1 }
 0x12c   : > { %v633_v53 = vpop.f32.mrb[1].mxu1 }
 0x149   : > { %v1094_v54 = vpop.f32.mrb[0].mxu0 }
 0x14a   : > { %v1095_v55 = vpop.f32.mrb[1].mxu0 }
 0x14b   : > { %v1096_v56 = vadd.f32 %v1095_v55, %v1094_v54  ;;  %v1135_v57 = vpop.f32.mrb[2].mxu1 }
 0x14c   : > { %v1136_v58 = vpop.f32.mrb[3].mxu1 }
 0x14d   : > { %v634_v59 = vadd.f32 %v1096_v56, %v633_v53  ;;  %v1137_v60 = vadd.f32 %v1136_v58, %v1135_v57  ;;  %v1097_v61 = vpop.f32.mrb[2].mxu0 }
 0x14e   : > { %v1098_v62 = vpop.f32.mrb[3].mxu0 }
 0x14f   : > { %v1099_v63 = vadd.f32 %v1098_v62, %v1097_v61  ;;  %v1138_v0 = vpop.f32.mrb[4].mxu1 }
 0x150   : > { %v1139_v1 = vpop.f32.mrb[5].mxu1 }
 0x151   : > { %v639_v2 = vadd.f32 %v1148_v52, %v1099_v63  ;;  %v1140_v3 = vadd.f32 %v1139_v1, %v1138_v0  ;;  %v1153_v4 = vpop.f32.mrb[4].mxu0 }
 0x152   : > { %v798_v5 = vpop.f32.mrb[5].mxu0 }
 0x153   : > { %v804_v6 = vadd.f32 %v1153_v4, %v1140_v3  ;;  %v799_v7 = vadd.f32 %v1137_v60, %v798_v5 }
 0x155   : > { %v808_v8 = vmul.f32 %v804_v6, %v639_v2  ;;  %v807_v9 = vmul.f32 %v799_v7, %v634_v59 }
 0x157   : > { %v809_v10 = vadd.f32 %v808_v8, %v807_v9 }
 0x159   : > { %v810_v11 = vrot.slane %v809_v10, 4 }
 0x15b   : > { %v811_v12 = vadd.f32 %v810_v11, %v809_v10 }
 0x15d   : > { %v812_v13 = vrot.slane %v811_v12, 2 }
 0x15f   : > { %v813_v14 = vadd.f32 %v812_v13, %v811_v12 }
 0x161   : > { %v814_v15 = vrot.slane %v813_v14, 1 }
 0x163   : > { %v815_v16 = vadd.f32 %v814_v15, %v813_v14 }
 0x165   : > { %816 = vst [vmem:[%s226_s8] sm:$0x1] %v815_v16 }
 0x166   : > { %1351 = shalt.err (!%p1348_p11)
}
 0x167   : > { %s1352_s27 = scalar_lea.hbm %s1758_s12, 16  ;;  %s1356_s22 = scalar_lea.hbm %s1804_s4, 32 }
 0x168   : > { %p1353_p13 = scmp.ne.s32.totalorder %s1758_s12, %s1352_s27  ;;  %p1357_p6 = scmp.lt.u32.totalorder %s1758_s12, %s1804_s4 }
 0x169   : > { %p1358_p9 = scmp.lt.u32.totalorder %s1356_s22, %s1352_s27  ;;  %p1360_p12 = scmp.lt.u32.totalorder %s1352_s27, %s1758_s12 }
 0x16a   : > { %p1354_p5 = pnand %p1353_p13, %p1823_p1 }
 0x16b   : > { %p1359_p10 = por %p1358_p9, %p1357_p6 }
 0x16c   : > { %p1355_p0 = pneg %p1354_p5 }
 0x16d   : > { %p1361_p2 = por %p1360_p12, %p1359_p10 }
 0x16f   : > { %p1362_p3 = pnand %p1361_p2, %p1355_p0 }
 0x171   : > { %1365 = shalt.err (!%p1362_p3)
}
 0x172   : > { %1226 = dma.vmem_to_hbm [thread:$0]  (%p1823_p1), %s1760_s9, 16, %s1758_s12, %s818_s29  }
 0x173 PF: > { %p1243_p4 = scmp.ge.s32.totalorder %s1408_s18, 2  ;;  %s842_s5 = sand.u32 1, %s1396_s15  }
 0x174   : > { %p1824_p7 = scmp.ne.s32.totalorder %s1811_s26, 0  ;;  %s843_s7 = scalar_lea.sflag [#allocation4], %s842_s5 }
 0x176   : > { %p1236_p8 = pnand %p1243_p4, %p1824_p7 }
 0x178   : > { %1391 = dma.done.wait (!%p1236_p8), %s843_s7, 16  }
 0x179   : > { %1393 = vsyncadd (!%p1236_p8), %s843_s7, 4294967280  ;;  %p16_p11 = scmp.ge.s32.totalorder %s1467_s21, 4   ;;  %s1825_s15 = smov %s1400_s16 }
 0x17a   : > { %s1826_s16 = smov %s1404_s17  ;;  %s1827_s17 = smov %s1478_s24 }
 0x17b   : > { %s1828_s18 = smov %s1467_s21  ;;  %18 = sbr.rel (!%p16_p11) target bundleno = 5 (0x5), region = 83 }
 0x182   :  { %847 = vsyncpa [#allocation3], 1 }
 0x183   :  { %849 = vsyncpa [#allocation3 + $0x1], 1 }
 0x184   :  { %850 = vsyncpa [#allocation6], 1 }
 0x185   :  { %851 = vsyncpa [#allocation4], 1 }
 0x186   :  { %853 = vsyncpa [#allocation4 + $0x1], 1 }

</bundles_post_ra>
